<compile_context>
chip_gen: v6e
topology: v6e:2x2x1
jax: 0.10.0
libtpu: 0.0.40
codegen_flags: <defaults>
</compile_context>

<pallas_src>
import math
from functools import partial

import jax
import jax.numpy as jnp
from jax.experimental import pallas as pl
from jax.experimental.pallas import tpu as pltpu


def _drop_path_kernel(mask_ref, x_ref, o_ref):
    # mask_ref: (TILE_N, 1) float32, values are 0.0 or 1/keep_prob.
    # x_ref/o_ref: (TILE_N, TILE_F) in the input dtype.
    o_ref[...] = (x_ref[...] * mask_ref[...]).astype(o_ref.dtype)


def _round_down(x: int, m: int) -> int:
    return (x // m) * m


def _select_tiles(n: int, f: int, itemsize: int,
                  budget_bytes: int = 4 * 1024 * 1024,
                  min_programs: int = 4):
    """Dtype-aware, byte-budget-driven tile selection."""
    # Sublane packing: 8 rows for 4-byte, 16 for 2-byte, 32 for 1-byte dtypes.
    align_n = max(8, 32 // itemsize)
    cap_n = 64  # multiple of 32 -> valid for all packings
    tile_n = n if n <= cap_n else max(align_n, _round_down(cap_n, align_n))

    # Lane tile from a byte budget, lane-dense (multiple of 128) or full-dim.
    max_f = budget_bytes // max(1, tile_n * itemsize)
    if f <= max_f:
        tile_f = f
    else:
        tile_f = max(128, _round_down(max_f, 128))

    # Keep >= min_programs grid steps so double-buffering works and v7x's two
    # TensorCores both get work (free on v5e/v6e, single TC).
    def n_programs(tn, tf):
        return pl.cdiv(n, tn) * pl.cdiv(f, tf)

    while n_programs(tile_n, tile_f) < min_programs and tile_f > 128:
        new_tf = max(128, _round_down(pl.cdiv(tile_f, 2), 128))
        if new_tf == tile_f:
            break
        tile_f = new_tf
    return tile_n, tile_f


@partial(jax.jit, static_argnames=("keep_prob",), donate_argnums=(0,))
def _drop_path_apply(x: jax.Array, key: jax.Array, *, keep_prob: float) -> jax.Array:
    n = x.shape[0]
    f = math.prod(x.shape[1:])
    itemsize = x.dtype.itemsize
    x2 = x.reshape(n, f)

    # Per-sample keep mask with 1/keep_prob folded in, kept in f32 for fidelity
    # (the multiply is HBM-bound; the f32 upcast of one vreg is free).
    keep = jax.random.bernoulli(key, keep_prob, (n, 1))
    mask = jnp.where(keep, jnp.float32(1.0 / keep_prob), jnp.float32(0.0))

    tile_n, tile_f = _select_tiles(n, f, itemsize)
    grid = (pl.cdiv(n, tile_n), pl.cdiv(f, tile_f))

    out = pl.pallas_call(
        _drop_path_kernel,
        out_shape=jax.ShapeDtypeStruct((n, f), x.dtype),
        grid=grid,
        in_specs=[
            pl.BlockSpec((tile_n, 1), lambda i, j: (i, 0)),        # mask
            pl.BlockSpec((tile_n, tile_f), lambda i, j: (i, j)),   # x
        ],
        out_specs=pl.BlockSpec((tile_n, tile_f), lambda i, j: (i, j)),
        # Write the result over the input buffer (the torch module is in-place);
        # together with jit donation this avoids a second HBM allocation.
        input_output_aliases={1: 0},
        compiler_params=pltpu.CompilerParams(
            dimension_semantics=("parallel", "parallel"),
            vmem_limit_bytes=48 << 20,
        ),
        cost_estimate=pl.CostEstimate(
            flops=n * f,
            transcendentals=0,
            bytes_accessed=2 * n * f * itemsize + n * 4,
        ),
    )(mask, x2)
    return out.reshape(x.shape)


def drop_path(x: jax.Array, p: float, training: bool,
              key: jax.Array | None = None) -> jax.Array:
    """Functional DropPath_.forward.  NOTE: `x` is donated when training and p>0."""
    if (not training) or p <= 0.0:
        return x
    if key is None:
        # TODO(synk): callers should thread a fresh PRNG key per step; a fixed
        # default key drops the same samples every call.
        key = jax.random.PRNGKey(0)
    return _drop_path_apply(x, key, keep_prob=float(1.0 - p))


class DropPathPallas:
    """Mirror of the PyTorch DropPath_ module (no parameters).

    Holds a JAX PRNG key and splits it per call so repeated forward passes
    resample the drop mask (matching torch's per-call Bernoulli draw).
    """

    def __init__(self, p: float = 0.0, key: jax.Array | None = None):
        self.p = p
        self.training = True
        self._key = key if key is not None else jax.random.PRNGKey(0)

    def __call__(self, x: jax.Array) -> jax.Array:
        if (not self.training) or self.p <= 0.0:
            return x
        self._key, sub = jax.random.split(self._key)
        return drop_path(x, self.p, self.training, key=sub)


if __name__ == "__main__":
    key = jax.random.PRNGKey(0)
    x = jax.random.normal(key, (2, 4, 16, 16), dtype=jnp.float32)  # NCHW

    mod = DropPathPallas(p=0.5, key=jax.random.PRNGKey(1234))
    mod.training = True
    # The jitted path donates its input (in-place semantics), so pass a copy
    # to keep `x` alive for the reference check.
    y = jax.block_until_ready(mod(jnp.copy(x)))

    # Sanity: each sample is either all-zero or x / keep_prob for that sample.
    keep_prob = 1.0 - mod.p
    for b in range(x.shape[0]):
        yb = y[b]
        is_zero = bool(jnp.all(yb == 0.0))
        is_scaled = bool(jnp.allclose(yb, x[b] / keep_prob, atol=1e-5))
        assert is_zero or is_scaled, "drop_path semantics violated"

    # Eval mode is identity (no donation happens on this path).
    mod.training = False
    y_eval = jax.block_until_ready(mod(x))
    assert bool(jnp.allclose(y_eval, x))

    # p=0 in training mode is also identity.
    mod0 = DropPathPallas(p=0.0)
    y0 = jax.block_until_ready(mod0(x))
    assert bool(jnp.allclose(y0, x))

    # bf16 path exercises dtype-aware tile selection and the f32 mask scale.
    xb = x.astype(jnp.bfloat16)
    mod_b = DropPathPallas(p=0.25, key=jax.random.PRNGKey(7))
    yb16 = jax.block_until_ready(mod_b(jnp.copy(xb)))
    assert yb16.shape == xb.shape and yb16.dtype == xb.dtype

    print("KERNEL_OK")
</pallas_src>

<mosaic_0001>
module attributes {stable_mosaic.version = 11 : i64} {
  func.func @_drop_path_kernel(%arg0: i32, %arg1: i32, %arg2: memref<2x1xf32, #tpu.memory_space<vmem>>, %arg3: memref<2x256xf32, #tpu.memory_space<vmem>>, %arg4: memref<2x256xf32, #tpu.memory_space<vmem>>) attributes {dimension_semantics = [#tpu.dimension_semantics<parallel>, #tpu.dimension_semantics<parallel>], iteration_bounds = array<i64: 1, 4>, scalar_prefetch = 0 : i64, scratch_operands = 0 : i64, tpu.core_type = #tpu.core_type<tc>, window_params = [{transform_indices = @transform_0, window_bounds = array<i64: 2, 1>}, {transform_indices = @transform_1, window_bounds = array<i64: 2, 256>}, {transform_indices = @transform_2, window_bounds = array<i64: 2, 256>}]} {
    %c0 = arith.constant 0 : index
    %c0_0 = arith.constant 0 : index
    %0 = vector.load %arg3[%c0, %c0_0] : memref<2x256xf32, #tpu.memory_space<vmem>>, vector<2x256xf32>
    %c0_1 = arith.constant 0 : index
    %c0_2 = arith.constant 0 : index
    %1 = vector.load %arg2[%c0_1, %c0_2] : memref<2x1xf32, #tpu.memory_space<vmem>>, vector<2x1xf32>
    %2 = vector.broadcast %1 : vector<2x1xf32> to vector<2x256xf32>
    %3 = arith.mulf %0, %2 : vector<2x256xf32>
    %c0_3 = arith.constant 0 : index
    %c0_4 = arith.constant 0 : index
    %4 = vector.load %arg4[%c0_3, %c0_4] : memref<2x256xf32, #tpu.memory_space<vmem>>, vector<2x256xf32>
    tpu.vector_store %arg4[%c0_3, %c0_4], %3 {strides = array<i32>} : memref<2x256xf32, #tpu.memory_space<vmem>>, vector<2x256xf32>,
    return
  }
  func.func @transform_0(%arg0: i32, %arg1: i32) -> (i32, i32) {
    %c0_i32 = arith.constant 0 : i32
    %c0_i32_0 = arith.constant 0 : i32
    return %arg0, %c0_i32 : i32, i32
  }
  func.func @transform_1(%arg0: i32, %arg1: i32) -> (i32, i32) {
    %c0_i32 = arith.constant 0 : i32
    return %arg0, %arg1 : i32, i32
  }
  func.func @transform_2(%arg0: i32, %arg1: i32) -> (i32, i32) {
    %c0_i32 = arith.constant 0 : i32
    return %arg0, %arg1 : i32, i32
  }
}

</mosaic_0001>

<bundles_post_ra>
// kernel: _drop_path_apply.1
= control target key start
LH: loop header
LB: loop body
LE: loop exit
PB: predicated region body
PF: predicated region fallthrough
CT: control target
= control target key end

     0   :  { %s398_s9 = smov 0   ;;  %s400_s10 = smov 0   ;;  %s431_s0 = inlined_call_operand.vmem [shape: f32[2,1], index: 0, kind: input, shape index: {}]   ;;  %s432_s1 = inlined_call_operand.vmem [shape: f32[2,1024], index: 1, kind: input, shape index: {}, may-alias: {1,2}]   ;;  %s433_s2 = inlined_call_operand.vmem [shape: f32[2,1024], index: 2, kind: output, shape index: {}, may-alias: {1,2}]  }
   0x1   :  { %s402_s11 = smov 0  }
   0x2 LB: > { %s21_s12 = sadd.s32 1, %s375_s10  ;;  %p323_p0 = scmp.ge.s32.totalorder %s379_s11, 1  ;;  %s379_s11 = sphi %s402_s11, %s12_s11   ;;  %s375_s10 = sphi %s400_s10, %s435_s10   ;;  %s371_s9 = sphi %s398_s9, %s434_s9  }
   0x3   : > { %p22_p1 = scmp.ge.s32.totalorder %s21_s12, 4  ;;  %p142_p2 = scmp.lt.s32.totalorder %s379_s11, 5 }
   0x5   : > { %s437_s12 = smov (%p22_p1, %s21_s12), 0  ;;  %p143_p3 = pnand %p323_p0, %p142_p2 }
   0x6   : > { %s324_s15 = sshll.u32 (!%p143_p3), %s371_s9, 1 }
   0x7   : > { %146 = sbr.rel (%p143_p3) target bundleno = 143 (0x8f), region = 28  ;;  %p183_p4 = scmp.lt.s32.totalorder (!%p143_p3), %s324_s15, 7 }
   0xc   : > { %v201_v0 = vld [vmem:[%s431_s0] sm:$0x3]  ;;  %v381_v1 = vmov 0   ;;  %v382_v2 = vmov 269488144   ;;  %v209_v4 = vlaneseq  ;;  %s439_s15 = smov (!%p183_p4, %s324_s15), 7 }
   0xd   : > { %356 = vset.pattern.permute.xlu0 %v381_v1  ;;  %v207_v3 = vunpack.c.l.s4 %v382_v2  ;;  %s325_s16 = sshll.u32 %s439_s15, 1 }
   0xe   : > { %204 = vperm.xlu0 %356, %v201_v0   ;;  %v210_v6 = vshrl.u32 %v209_v4, 7  ;;  %s188_s19 = scalar_lea.vmem %s432_s1, %s325_s16  ;;  %s198_s22 = scalar_lea.vmem %s433_s2, %s325_s16 }
   0xf   : > { %v208_v5 = vunpack.c.0.s8 %v207_v3  ;;  %v200_v9 = vld [vmem:[%s188_s19] sm:$0xf] }
  0x11   : > { %v211_v7 = vsub.s32 %v208_v5, %v210_v6 }
  0x89   : > { %v205_v8 = vpop.permute.xlu0 %204 }
  0x8a   : > { %v212_v10 = vrot.slane %v205_v8, %v211_v7 }
  0x8c   : > { %v214_v11 = vmul.f32 %v212_v10, %v200_v9 }
  0x8e   : > { %215 = vst [vmem:[%s198_s22] sm:$0xf] %v214_v11 }
  0x8f PF: > { %s12_s11 = sadd.s32 1, %s379_s11   ;;  %s434_s9 = smov %s375_s10 }
  0x90   : > { %p9_p5 = scmp.ge.s32.totalorder %s12_s11, 6   ;;  %s435_s10 = smov %s437_s12 }
  0x92   :  { %11 = sbr.rel (!%p9_p5) target bundleno = 2 (0x2), region = 61 }

</bundles_post_ra>
